<compile_context>
chip_gen: v5e
topology: v5e:2x2
jax: 0.10.0
libtpu: 0.0.40
codegen_flags: <defaults>
</compile_context>

<pallas_src>
import jax
import jax.numpy as jnp
from jax.experimental import pallas as pl
from jax.experimental.pallas import tpu as pltpu


def _round_up(x, m):
    return ((x + m - 1) // m) * m


def _lane_pack_width():
    """Output-slab lane width.

    v6e/v7x have 2x256^2 MXUs, so 256-lane slabs halve the vmatmul push
    cadence per output byte; v5e's 4x128^2 MXU gets no benefit from N=256, so
    it (and any unknown chip) keeps the safe 128-lane packing.
    """
    try:
        kind = jax.devices()[0].device_kind.lower()
    except Exception:
        return 128
    if "v6" in kind or "v7" in kind:
        return 256
    return 128


def _vmem_capacity_bytes():
    """Physical VMEM per core; conservative 64 MiB (v7x floor) if unknown."""
    try:
        return int(pltpu.get_tpu_info().vmem_capacity_bytes)
    except Exception:
        return 64 * 1024 * 1024


def _choose_packing(d_model, lane_width):
    """Return (d_pad, g): pad the feature dim to d_pad and pack g rows/slab.

    Guarantees the output block's last dim (g * d_pad) is either `lane_width`
    or a multiple of 128, so stores are always full-width unmasked vst's.
    """
    if d_model % 128 == 0:
        return d_model, 1
    if d_model < lane_width:
        d_pad = d_model
        while lane_width % d_pad:
            d_pad += 1
        return d_pad, lane_width // d_pad
    return _round_up(d_model, 128), 1


def _embedding_kernel(idx_ref, table_ref, out_ref):
    """One grid step: gather G interleaved embedding rows per packed output row.

    idx_ref:   (TMr, G)               int8/int16/int32 original indices
    table_ref: (G*num_degree, G*Dp)   block-diagonal embedding table
    out_ref:   (TMr, G*Dp)            lane-dense output slab
    """
    idx = idx_ref[...].astype(jnp.int32)      # widen narrow indices in-kernel
    tmr, g = idx.shape
    k = table_ref.shape[0]                    # G * num_degree
    num_degree = k // g

    # One compare per packed group: column l of the one-hot is hot iff
    # l == idx[row, j] + j*num_degree for its group j.  g is a small static
    # Python int, so this unrolls into a handful of VPU compare+adds
    # (hits are disjoint, so sum == select).
    lane = jax.lax.broadcasted_iota(jnp.int32, (tmr, k), 1)
    onehot = jnp.zeros((tmr, k), table_ref.dtype)
    for j in range(g):
        hit = lane == (idx[:, j:j + 1] + j * num_degree)
        onehot = onehot + hit.astype(table_ref.dtype)

    out_ref[...] = jnp.dot(
        onehot, table_ref[...], preferred_element_type=jnp.float32
    ).astype(out_ref.dtype)


def _embedding_pallas(idx_flat, table, *, tm_rows, lane_width, out_dtype):
    """idx_flat: (M,) int32 indices; table: (num_degree, D). Returns (M, D)."""
    M = idx_flat.shape[0]
    num_degree, d_model = table.shape
    out_dtype = jnp.dtype(out_dtype)

    # bf16 output (explicit opt-in): also carry the table in bf16 so the MXU
    # matmul is a single bf16 pass instead of the f32 emulation.
    if out_dtype != table.dtype and out_dtype.itemsize < table.dtype.itemsize:
        table = table.astype(out_dtype)

    # Lane-dense packing (pad feature dim if it doesn't divide the slab width).
    d_pad, g = _choose_packing(d_model, lane_width)
    if d_pad != d_model:
        table = jnp.pad(table, ((0, 0), (0, d_pad - d_model)))
    w_out = g * d_pad                                   # output slab width

    # Narrow index dtype for the HBM->VMEM index stream (widened in-kernel).
    if num_degree <= 127:
        idx_dtype = jnp.int8
    elif num_degree <= 32767:
        idx_dtype = jnp.int16
    else:
        idx_dtype = jnp.int32

    # --- Tile size ------------------------------------------------------
    total_packed = -(-M // g)                           # packed rows of work
    tmr = max(32, min(tm_rows // g, total_packed))
    tmr = _round_up(tmr, 32)                            # int8 sublane tiling

    # Keep >= 2 grid steps whenever there is enough work: the "parallel" grid
    # axis is sharded across v7x's 2 TensorCores; a 1-step grid idles one.
    if total_packed >= 64 and total_packed < 2 * tmr:
        tmr = _round_up(-(-total_packed // 2), 32)

    # VMEM budget (v7x has 64 MiB/TC vs 128 MiB on v5e/v6e): shrink the tile
    # until the double-buffered index + output tiles plus the resident table
    # fit comfortably under the scoped limit.
    vmem_limit = min(48 << 20, (_vmem_capacity_bytes() * 3) // 4)
    table_bytes = 2 * (g * num_degree) * w_out * table.dtype.itemsize
    tile_budget = max(4 << 20, vmem_limit - table_bytes - (4 << 20))
    idx_item = jnp.dtype(idx_dtype).itemsize
    out_item = out_dtype.itemsize

    def _tiles_bytes(t):
        # idx tile lane-pads its tiny last dim to 128 lanes in VMEM.
        return 2 * (t * w_out * out_item + t * 128 * idx_item)

    while tmr > 32 and _tiles_bytes(tmr) > tile_budget:
        tmr = max(32, _round_up(tmr // 2, 32))

    # --- Inputs ----------------------------------------------------------
    mp = _round_up(M, tmr * g)                          # padded row count
    idx_p = jnp.pad(idx_flat, (0, mp - M)).astype(idx_dtype)   # pad rows -> id 0
    idx2 = idx_p.reshape(mp // g, g)

    # Block-diagonal table: block (j, j) == table  ->  (G*V, G*Dp).
    table_bd = jnp.kron(jnp.eye(g, dtype=table.dtype), table) if g > 1 else table

    grid = (mp // (tmr * g),)
    out = pl.pallas_call(
        _embedding_kernel,
        out_shape=jax.ShapeDtypeStruct((mp // g, w_out), out_dtype),
        grid=grid,
        in_specs=[
            # Index tile, pipelined along the grid (narrow dtype, widened in-kernel).
            pl.BlockSpec((tmr, g), lambda i: (i, 0)),
            # Tiny table: same block every step -> stays resident in VMEM.
            # (Double-buffering it costs < table_bytes, negligible next to the
            # output tiles, so we skip pipeline_mode=pl.Buffered(1).)
            pl.BlockSpec((g * num_degree, w_out), lambda i: (0, 0)),
        ],
        out_specs=pl.BlockSpec((tmr, w_out), lambda i: (i, 0)),
        compiler_params=pltpu.CompilerParams(
            dimension_semantics=("parallel",),          # megacore-shard M on v7x
            vmem_limit_bytes=vmem_limit,
        ),
    )(idx2, table_bd)

    # Undo lane-dense packing (contiguous reshape), strip pad rows / pad cols.
    out = out.reshape(mp, d_pad)
    if d_pad != d_model:
        out = out[:, :d_model]
    return out[:M]


def spatial_node_feature(degree, table, *, tm_rows=None, min_kernel_rows=1024,
                         output_dtype=None):
    """JAX/Pallas equivalent of SpatialNodeFeature.forward.

    degree:       (B, N) int array of node degrees.
    table:        (num_degree, d_model) embedding weights (nn.Embedding.weight).
    output_dtype: optional narrower dtype (e.g. jnp.bfloat16) to halve HBM
                  writes; defaults to table.dtype (exact semantics).
    returns:      (B, N, d_model).
    """
    B, N = degree.shape
    num_degree, d_model = table.shape
    out_dtype = table.dtype if output_dtype is None else jnp.dtype(output_dtype)
    M = B * N
    idx_flat = degree.reshape(M).astype(jnp.int32)

    # TODO(synk): for very large vocabularies a one-hot matmul is wasteful; a
    # DMA-gather kernel would be the right tool — fall back to XLA gather there.
    use_kernel = (M >= min_kernel_rows) and (num_degree <= 1024)

    if not use_kernel:
        out_flat = jnp.take(table, idx_flat, axis=0).astype(out_dtype)
    else:
        lane_width = _lane_pack_width()
        if tm_rows is None:
            # v5e saturates earlier (0.82 TB/s HBM, 1 vst slot); v6e/v7x keep
            # gaining from larger tiles.
            tm_rows = 16384 if lane_width == 128 else 32768
        out_flat = _embedding_pallas(idx_flat, table, tm_rows=tm_rows,
                                     lane_width=lane_width, out_dtype=out_dtype)

    return out_flat.reshape(B, N, d_model)


if __name__ == "__main__":
    num_degree, d_model = 16, 32
    key = jax.random.PRNGKey(0)
    k_tab, k_small, k_big, k_pad = jax.random.split(key, 4)

    # nn.Embedding default init is N(0, 1).
    table = jax.random.normal(k_tab, (num_degree, d_model), dtype=jnp.float32)

    # 1) Tiny graph (B=2, N=8): exercises the size-gated jnp.take fast path.
    deg_small = jax.random.randint(k_small, (2, 8), 0, num_degree, dtype=jnp.int32)
    out_small = jax.block_until_ready(spatial_node_feature(deg_small, table))
    ref_small = jnp.take(table, deg_small, axis=0)
    assert out_small.shape == (2, 8, d_model), out_small.shape
    assert jnp.allclose(out_small, ref_small, atol=1e-6), "small-path mismatch"

    # 2) Kernel path (B=2, N=640 -> M=1280) with a small tm_rows so the grid
    #    has several steps including a padded final tile.
    B, N = 2, 640
    deg = jax.random.randint(k_big, (B, N), 0, num_degree, dtype=jnp.int32)
    out = jax.block_until_ready(
        spatial_node_feature(deg, table, tm_rows=512, min_kernel_rows=1)
    )
    ref = jnp.take(table, deg, axis=0)
    assert out.shape == (B, N, d_model), out.shape
    assert jnp.allclose(out, ref, atol=1e-6), "mismatch vs reference lookup"

    # 2b) Same inputs through the default large-tile configuration
    #     (>= 2 grid steps enforced for megacore).
    out_def = jax.block_until_ready(
        spatial_node_feature(deg, table, min_kernel_rows=1)
    )
    assert jnp.allclose(out_def, ref, atol=1e-6), "default-config mismatch"

    # 3) d_model that does not divide 128 (d_model=40): exercises the
    #    feature-padding path that keeps stores full-lane-width.
    d_odd = 40
    table_odd = jax.random.normal(k_pad, (num_degree, d_odd), dtype=jnp.float32)
    deg_odd = jax.random.randint(k_big, (2, 520), 0, num_degree, dtype=jnp.int32)
    out_odd = jax.block_until_ready(
        spatial_node_feature(deg_odd, table_odd, min_kernel_rows=1)
    )
    ref_odd = jnp.take(table_odd, deg_odd, axis=0)
    assert out_odd.shape == (2, 520, d_odd), out_odd.shape
    assert jnp.allclose(out_odd, ref_odd, atol=1e-6), "padded-d_model mismatch"

    print("KERNEL_OK")
</pallas_src>

<mosaic_0001>
module attributes {stable_mosaic.version = 11 : i64} {
  func.func @_embedding_kernel(%arg0: i32, %arg1: memref<128x4xi8, #tpu.memory_space<vmem>>, %arg2: memref<64x128xf32, #tpu.memory_space<vmem>>, %arg3: memref<128x128xf32, #tpu.memory_space<vmem>>) attributes {dimension_semantics = [#tpu.dimension_semantics<parallel>], iteration_bounds = array<i64: 3>, scalar_prefetch = 0 : i64, scratch_operands = 0 : i64, tpu.core_type = #tpu.core_type<tc>, window_params = [{transform_indices = @transform_0, window_bounds = array<i64: 128, 4>}, {pipeline_mode = #tpu.pipeline_mode<synchronous>, transform_indices = @transform_1, window_bounds = array<i64: 64, 128>}, {transform_indices = @transform_2, window_bounds = array<i64: 128, 128>}]} {
    %c0 = arith.constant 0 : index
    %c0_0 = arith.constant 0 : index
    %0 = vector.load %arg1[%c0, %c0_0] : memref<128x4xi8, #tpu.memory_space<vmem>>, vector<128x4xi8>
    %1 = arith.extsi %0 : vector<128x4xi8> to vector<128x4xi32>
    %2 = tpu.iota {dimensions = array<i32: 1>} : vector<128x64xi32>
    %cst = arith.constant 0.000000e+00 : f32
    %3 = vector.broadcast %cst : f32 to vector<128x64xf32>
    %4 = vector.extract_strided_slice %1 {offsets = [0, 0], sizes = [128, 1], strides = [1, 1]} : vector<128x4xi32> to vector<128x1xi32>
    %c0_i32 = arith.constant 0 : i32
    %5 = vector.broadcast %c0_i32 : i32 to vector<128x1xi32>
    %6 = arith.addi %4, %5 : vector<128x1xi32>
    %7 = vector.broadcast %6 : vector<128x1xi32> to vector<128x64xi32>
    %8 = arith.cmpi eq, %2, %7 : vector<128x64xi32>
    %9 = arith.extui %8 : vector<128x64xi1> to vector<128x64xi32>
    %10 = arith.sitofp %9 : vector<128x64xi32> to vector<128x64xf32>
    %11 = arith.addf %3, %10 : vector<128x64xf32>
    %12 = vector.extract_strided_slice %1 {offsets = [0, 1], sizes = [128, 1], strides = [1, 1]} : vector<128x4xi32> to vector<128x1xi32>
    %c16_i32 = arith.constant 16 : i32
    %13 = vector.broadcast %c16_i32 : i32 to vector<128x1xi32>
    %14 = arith.addi %12, %13 : vector<128x1xi32>
    %15 = vector.broadcast %14 : vector<128x1xi32> to vector<128x64xi32>
    %16 = arith.cmpi eq, %2, %15 : vector<128x64xi32>
    %17 = arith.extui %16 : vector<128x64xi1> to vector<128x64xi32>
    %18 = arith.sitofp %17 : vector<128x64xi32> to vector<128x64xf32>
    %19 = arith.addf %11, %18 : vector<128x64xf32>
    %20 = vector.extract_strided_slice %1 {offsets = [0, 2], sizes = [128, 1], strides = [1, 1]} : vector<128x4xi32> to vector<128x1xi32>
    %c32_i32 = arith.constant 32 : i32
    %21 = vector.broadcast %c32_i32 : i32 to vector<128x1xi32>
    %22 = arith.addi %20, %21 : vector<128x1xi32>
    %23 = vector.broadcast %22 : vector<128x1xi32> to vector<128x64xi32>
    %24 = arith.cmpi eq, %2, %23 : vector<128x64xi32>
    %25 = arith.extui %24 : vector<128x64xi1> to vector<128x64xi32>
    %26 = arith.sitofp %25 : vector<128x64xi32> to vector<128x64xf32>
    %27 = arith.addf %19, %26 : vector<128x64xf32>
    %28 = vector.extract_strided_slice %1 {offsets = [0, 3], sizes = [128, 1], strides = [1, 1]} : vector<128x4xi32> to vector<128x1xi32>
    %c48_i32 = arith.constant 48 : i32
    %29 = vector.broadcast %c48_i32 : i32 to vector<128x1xi32>
    %30 = arith.addi %28, %29 : vector<128x1xi32>
    %31 = vector.broadcast %30 : vector<128x1xi32> to vector<128x64xi32>
    %32 = arith.cmpi eq, %2, %31 : vector<128x64xi32>
    %33 = arith.extui %32 : vector<128x64xi1> to vector<128x64xi32>
    %34 = arith.sitofp %33 : vector<128x64xi32> to vector<128x64xf32>
    %35 = arith.addf %27, %34 : vector<128x64xf32>
    %c0_1 = arith.constant 0 : index
    %c0_2 = arith.constant 0 : index
    %36 = vector.load %arg2[%c0_1, %c0_2] : memref<64x128xf32, #tpu.memory_space<vmem>>, vector<64x128xf32>
    %cst_3 = arith.constant dense<0.000000e+00> : vector<128x128xf32>
    %37 = tpu.matmul %35, %36, %cst_3 {dimension_numbers = #tpu.dot_dimension_numbers<[1], [0], [0], [1], [0, 0, 1, 1], [], []>} : vector<128x64xf32>, vector<64x128xf32>, vector<128x128xf32> -> vector<128x128xf32>
    %c0_4 = arith.constant 0 : index
    %c0_5 = arith.constant 0 : index
    %38 = vector.load %arg3[%c0_4, %c0_5] : memref<128x128xf32, #tpu.memory_space<vmem>>, vector<128x128xf32>
    tpu.vector_store %arg3[%c0_4, %c0_5], %37 {strides = array<i32>} : memref<128x128xf32, #tpu.memory_space<vmem>>, vector<128x128xf32>,
    return
  }
  func.func @transform_0(%arg0: i32) -> (i32, i32) {
    %c0_i32 = arith.constant 0 : i32
    %c0_i32_0 = arith.constant 0 : i32
    return %arg0, %c0_i32 : i32, i32
  }
  func.func @transform_1(%arg0: i32) -> (i32, i32) {
    %c0_i32 = arith.constant 0 : i32
    %c0_i32_0 = arith.constant 0 : i32
    %c0_i32_1 = arith.constant 0 : i32
    return %c0_i32, %c0_i32_0 : i32, i32
  }
  func.func @transform_2(%arg0: i32) -> (i32, i32) {
    %c0_i32 = arith.constant 0 : i32
    %c0_i32_0 = arith.constant 0 : i32
    return %arg0, %c0_i32 : i32, i32
  }
}

</mosaic_0001>

<bundles_post_ra>
// kernel: tpu_custom_call.1
= control target key start
LH: loop header
LB: loop body
LE: loop exit
PB: predicated region body
PF: predicated region fallthrough
CT: control target
= control target key end

     0   :  { %7 = vsyncpa [#allocation3], 0  ;;  %s1685_s0 = inlined_call_operand.vmem [shape: s8[384,4], index: 0, kind: input, shape index: {}]   ;;  %s1686_s1 = inlined_call_operand.vmem [shape: f32[64,128], index: 1, kind: input, shape index: {}]   ;;  %s1687_s2 = inlined_call_operand.hbm [shape: f32[384,128], index: 2, kind: output, shape index: {}]  }
   0x1   :  { %9 = vsyncpa [#allocation3 + $0x1], 0  ;;  %s1205_s9 = smov 0   ;;  %s1207_s10 = smov 0  }
   0x2   :  { %s1209_s11 = smov 0   ;;  %s1211_s12 = smov 0  }
   0x3 LB: > { %s1226_s13 = sadd.s32 4294967295, %s1181_s12   ;;  %s891_s14 = sadd.s32 4294967294, %s1181_s12   ;;  %s1181_s12 = sphi %s1211_s12, %s1693_s12   ;;  %s1177_s11 = sphi %s1209_s11, %s1692_s11   ;;  %s1173_s10 = sphi %s1207_s10, %s1691_s10   ;;  %s1169_s9 = sphi %s1205_s9, %s1690_s9  }
   0x4   : > { %s1230_s15 = sadd.s32 1, %s1181_s12   ;;  %s69_s16 = sadd.s32 1, %s1177_s11 }
   0x5   : > { %s66_s17 = ssub.s32 %s1181_s12, %s1230_s15  ;;  %p79_p0 = scmp.ne.s32.totalorder %s1177_s11, %s1173_s10 }
   0x6   : > { %p67_p1 = scmp.eq.s32.totalorder %s66_s17, 0  ;;  %p80_p2 = scmp.eq.s32.totalorder %s1226_s13, 2 }
   0x7   : > { %p85_p3 = scmp.ne.s32.totalorder %s1173_s10, %s1169_s9  ;;  %p86_p4 = scmp.eq.s32.totalorder %s891_s14, 2 }
   0x8   : > { %s1241_s18 = scalar_select %p67_p1, %s1177_s11, %s69_s16  }
   0x9   : > { %p1243_p5 = por %p80_p2, %p79_p0  ;;  %p1247_p6 = por %p86_p4, %p85_p3 }
   0xa   : > { %p894_p7 = scmp.ge.s32.totalorder %s1181_s12, 1  ;;  %p116_p8 = scmp.lt.s32.totalorder %s1181_s12, 4 }
   0xc   : > { %p117_p9 = pnand %p894_p7, %p116_p8 }
   0xd   : > { %s896_s21 = sshll.u32 (!%p117_p9), %s1226_s13, 4  ;;  %s135_s23 = sand.u32 (!%p117_p9), 1, %s1173_s10  }
   0xe   : > { %120 = sbr.rel (%p117_p9) target bundleno = 464 (0x1d0), region = 28  ;;  %p139_p10 = scmp.lt.s32.totalorder (!%p117_p9), %s896_s21, 47 }
   0xf   : > { %s895_s24 = sshll.u32 (!%p117_p9), %s135_s23, 7  ;;  %s983_s26 = sshll.u32 (!%p117_p9), %s1226_s13, 7 }
  0x10   : > { %s825_s29 = scalar_lea.hbm (!%p117_p9), %s1687_s2, %s983_s26  ;;  %s814_s4 = scalar_lea.sflag (!%p117_p9), [#allocation3], %s135_s23 }
  0x11   : > { %s828_s3 = sshll.u32 (!%p117_p9), %s825_s29, 4  ;;  %s1139_s8 = scalar_lea.hbm (!%p117_p9), %s1687_s2, 384  ;;  %s829_s3 = int_to_ptr.hbm [resolvable:$true] %s828_s3 }
  0x12   : > { %s1133_s5 = sshra.s32 (!%p117_p9), %s829_s3, 4  ;;  %s1134_s5 = int_to_ptr.hbm [resolvable:$true] %s1133_s5 }
  0x13   : > { %v1183_v0 = vmov 0   ;;  %s1695_s21 = smov (!%p139_p10, %s896_s21), 47  ;;  %v1184_v23 = vmov 1   ;;  %v1185_v39 = vmov 2   ;;  %v1186_v40 = vmov 3   ;;  %s1135_s6 = scalar_lea.hbm %s1134_s5, 128 }
  0x14   : > { %1095 = vset.pattern.permute.xlu2 %v1183_v0  ;;  %1094 = vset.pattern.permute.xlu1 %v1183_v0  ;;  %s897_s22 = sshll.u32 %s1695_s21, 1  ;;  %v177_v60 = vlaneseq  ;;  %p1136_p11 = scmp.ne.s32.totalorder %s1134_s5, %s1135_s6 }
  0x15   : > { %1093 = vset.pattern.permute.xlu0 %v1183_v0  ;;  %s142_s25 = scalar_lea.vmem %s1685_s0, %s897_s22  ;;  %p1140_p0 = scmp.lt.s32.totalorder %s1134_s5, %s1687_s2 }
  0x16   : > { %v1041_v1 = vld [vmem:[%s142_s25 + $0x8] sm:$0xff]   ;;  %v1040_v2 = vld [vmem:[%s142_s25] sm:$0xff]   ;;  %v1043_v9 = vld [vmem:[%s142_s25 + $0x10] sm:$0xff]   ;;  %p1137_p12 = pnand %p1136_p11, %p1243_p5  ;;  %p1141_p1 = scmp.lt.s32.totalorder %s1139_s8, %s1135_s6 }
  0x17   : > { %v1257_v3 = vunpack.c.0.s8 %v1041_v1  ;;  %v1259_v4 = vunpack.c.2.s8 %v1040_v2  ;;  %v1261_v5 = vunpack.c.0.s8 %v1040_v2  ;;  %v1266_v6 = vunpack.c.1.s8 %v1041_v1  ;;  %v1046_v16 = vld [vmem:[%s142_s25 + $0x18] sm:$0xff]   ;;  %s1633_s25 = scalar_lea.vmem [#allocation2], %s895_s24 }
  0x18   : > { %v1268_v7 = vunpack.c.3.s8 %v1040_v2  ;;  %v1270_v8 = vunpack.c.1.s8 %v1040_v2  ;;  %v1275_v10 = vunpack.c.0.s8 %v1043_v9  ;;  %v1277_v11 = vunpack.c.3.s8 %v1041_v1  ;;  %s826_s30 = sshll.u32 %s1633_s25, 4  ;;  %p1138_p13 = pneg %p1137_p12  ;;  %s827_s30 = int_to_ptr.vmem [resolvable:$true] %s826_s30 }
  0x19   : > { %192 = vperm.xlu2 %1095, %v1257_v3   ;;  %186 = vperm.xlu1 %1094, %v1259_v4   ;;  %v1279_v12 = vunpack.c.2.s8 %v1041_v1  ;;  %v1284_v13 = vunpack.c.3.s8 %v1043_v9  ;;  %v1286_v14 = vunpack.c.2.s8 %v1043_v9  ;;  %v1288_v15 = vunpack.c.1.s8 %v1043_v9  ;;  %p1142_p2 = por %p1141_p1, %p1140_p0 }
  0x1a   : > { %180 = vperm.xlu0 %1093, %v1261_v5   ;;  %v1293_v17 = vunpack.c.2.s8 %v1046_v16  ;;  %v1295_v18 = vunpack.c.1.s8 %v1046_v16  ;;  %v1010_v19 = vunpack.c.0.s8 %v1046_v16  ;;  %v1299_v20 = vunpack.c.3.s8 %v1046_v16 }
  0x1b   : > { %v292_v21 = vadd.s32 16, %v1270_v8  ;;  %v291_v22 = vadd.s32 16, %v1261_v5  ;;  %v295_v24 = vadd.s32 16, %v1257_v3  ;;  %v293_v25 = vadd.s32 16, %v1259_v4  ;;  %p1143_p3 = pnand %p1142_p2, %p1138_p13 }
  0x1c   : > { %v294_v26 = vadd.s32 16, %v1268_v7  ;;  %v297_v27 = vadd.s32 16, %v1279_v12  ;;  %v298_v28 = vadd.s32 16, %v1277_v11  ;;  %v296_v29 = vadd.s32 16, %v1266_v6 }
  0x1d   : > { %v300_v30 = vadd.s32 16, %v1288_v15  ;;  %v301_v31 = vadd.s32 16, %v1286_v14  ;;  %v299_v32 = vadd.s32 16, %v1275_v10  ;;  %v303_v33 = vadd.s32 16, %v1010_v19 }
  0x1e   : > { %v304_v34 = vadd.s32 16, %v1295_v18  ;;  %v302_v35 = vadd.s32 16, %v1284_v13  ;;  %v305_v36 = vadd.s32 16, %v1293_v17  ;;  %v427_v37 = vadd.s32 32, %v1275_v10 }
  0x1f   : > { %v551_v38 = vadd.s32 48, %v1257_v3  ;;  %v561_v41 = vadd.s32 48, %v1293_v17  ;;  %v555_v42 = vadd.s32 48, %v1275_v10  ;;  %v559_v43 = vadd.s32 48, %v1010_v19 }
  0x20   : > { %v431_v45 = vadd.s32 32, %v1010_v19  ;;  %v419_v46 = vadd.s32 32, %v1261_v5  ;;  %v423_v48 = vadd.s32 32, %v1257_v3  ;;  %v428_v49 = vadd.s32 32, %v1288_v15 }
  0x21   : > { %195 = vperm.xlu2 %1095, %v1266_v6   ;;  %189 = vperm.xlu1 %1094, %v1268_v7   ;;  %v432_v50 = vadd.s32 32, %v1295_v18  ;;  %v547_v52 = vadd.s32 48, %v1261_v5  ;;  %v429_v53 = vadd.s32 32, %v1286_v14  ;;  %v556_v56 = vadd.s32 48, %v1288_v15 }
  0x22   : > { %183 = vperm.xlu0 %1093, %v1270_v8   ;;  %v560_v58 = vadd.s32 48, %v1295_v18  ;;  %v434_v59 = vadd.s32 32, %v1299_v20  ;;  %v420_v0 = vadd.s32 32, %v1270_v8  ;;  %v424_v1 = vadd.s32 32, %v1266_v6 }
  0x23   : > { %v1359_v2 = vand.u32 127, %v177_v60  ;;  %v422_v3 = vadd.s32 32, %v1268_v7  ;;  %v1187_v9 = vmov 0.0  }
  0x29   : > { %204 = vperm.xlu2 %1095, %v1275_v10   ;;  %201 = vperm.xlu1 %1094, %v1277_v11  }
  0x2a   : > { %198 = vperm.xlu0 %1093, %v1279_v12  }
  0x31   : > { %213 = vperm.xlu2 %1095, %v1284_v13   ;;  %210 = vperm.xlu1 %1094, %v1286_v14  }
  0x32   : > { %207 = vperm.xlu0 %1093, %v1288_v15  }
  0x39   : > { %222 = vperm.xlu2 %1095, %v1293_v17   ;;  %219 = vperm.xlu1 %1094, %v1295_v18   ;;  %v433_v18 = vadd.s32 32, %v1293_v17  ;;  %v552_v17 = vadd.s32 48, %v1266_v6 }
  0x3a   : > { %216 = vperm.xlu0 %1093, %v1010_v19  }
  0x41   : > { %1097 = vset.pattern.permute.xlu2 %v1184_v23  ;;  %1096 = vset.pattern.permute.xlu1 %v1184_v23 }
  0x42   : > { %225 = vperm.xlu0 %1093, %v1299_v20   ;;  %311 = vperm.xlu2 %1097, %v292_v21   ;;  %v548_v21 = vadd.s32 48, %v1270_v8 }
  0x43   : > { %308 = vperm.xlu1 %1096, %v291_v22  }
  0x4a   : > { %1098 = vset.pattern.permute.xlu0 %v1184_v23  ;;  %320 = vperm.xlu2 %1097, %v295_v24  }
  0x4b   : > { %314 = vperm.xlu0 %1098, %v293_v25   ;;  %317 = vperm.xlu1 %1096, %v294_v26  }
  0x52   : > { %326 = vperm.xlu2 %1097, %v297_v27   ;;  %v557_v27 = vadd.s32 48, %v1286_v14  ;;  %v306_v14 = vadd.s32 16, %v1299_v20 }
  0x53   : > { %329 = vperm.xlu0 %1098, %v298_v28   ;;  %323 = vperm.xlu1 %1096, %v296_v29  }
  0x5a   : > { %335 = vperm.xlu2 %1097, %v300_v30  }
  0x5b   : > { %338 = vperm.xlu0 %1098, %v301_v31   ;;  %332 = vperm.xlu1 %1096, %v299_v32   ;;  %v421_v32 = vadd.s32 32, %v1259_v4 }
  0x62   : > { %344 = vperm.xlu2 %1097, %v303_v33  }
  0x63   : > { %347 = vperm.xlu0 %1098, %v304_v34   ;;  %341 = vperm.xlu1 %1096, %v302_v35  }
  0x6a   : > { %1099 = vset.pattern.permute.xlu2 %v1185_v39 }
  0x6b   : > { %1105 = vset.pattern.permute.xlu0 %v1186_v40  ;;  %350 = vperm.xlu1 %1096, %v305_v36   ;;  %v682_v36 = vld [vmem:[%s1686_s1 + $0x38] sm:$0xff] }
  0x6c   : > { %460 = vperm.xlu2 %1099, %v427_v37   ;;  %576 = vperm.xlu0 %1105, %v551_v38  }
  0x6d   : > { %1016 = vmatpush.msra.mxu1 %v682_v36  ;;  %1017 = vmatpush.msra.mxu2 %v682_v36 }
  0x6e   : > { %740 = vmatpush.msra.mxu0 %v682_v36  ;;  %1018 = vmatpush.msra.mxu3 %v682_v36 }
  0x73   : > { %1100 = vset.pattern.permute.xlu1 %v1186_v40  ;;  %v1326_v44 = vpop.permute.xlu2 %192 }
  0x74   : > { %1101 = vset.pattern.permute.xlu2 %v1186_v40  ;;  %606 = vperm.xlu0 %1105, %v561_v41   ;;  %v681_v41 = vld [vmem:[%s1686_s1 + $0x30] sm:$0xff] }
  0x75   : > { %588 = vperm.xlu1 %1100, %v555_v42   ;;  %600 = vperm.xlu2 %1101, %v559_v43   ;;  %v430_v43 = vadd.s32 32, %v1284_v13 }
  0x76   : > { %1019 = vmatpush.msra.mxu1 %v681_v41  ;;  %1020 = vmatpush.msra.mxu2 %v681_v41 }
  0x77   : > { %741 = vmatpush.msra.mxu0 %v681_v41  ;;  %1021 = vmatpush.msra.mxu3 %v681_v41 }
  0x7b   : > { %v1330_v47 = vpop.permute.xlu2 %195 }
  0x7c   : > { %1111 = vset.pattern.permute.xlu0 %v1185_v39  ;;  %vm232_vm10 = vcmp.eq.s32.totalorder %v1359_v2, %v1330_v47 }
  0x7d   : > { %1102 = vset.pattern.permute.xlu1 %v1185_v39  ;;  %1103 = vset.pattern.permute.xlu2 %v1185_v39 }
  0x7e   : > { %472 = vperm.xlu0 %1111, %v431_v45   ;;  %436 = vperm.xlu1 %1102, %v419_v46   ;;  %v425_v45 = vadd.s32 32, %v1279_v12  ;;  %v680_v46 = vld [vmem:[%s1686_s1 + $0x28] sm:$0xff] }
  0x7f   : > { %448 = vperm.xlu2 %1103, %v423_v48   ;;  %1022 = vmatpush.msra.mxu1 %v680_v46  ;;  %v679_v48 = vld [vmem:[%s1686_s1 + $0x20] sm:$0xff] }
  0x80   : > { %1023 = vmatpush.msra.mxu2 %v680_v46  ;;  %742 = vmatpush.msra.mxu0 %v680_v46 }
  0x81   : > { %1025 = vmatpush.msra.mxu1 %v679_v48  ;;  %1024 = vmatpush.msra.mxu3 %v680_v46 }
  0x82   : > { %1026 = vmatpush.msra.mxu2 %v679_v48  ;;  %743 = vmatpush.msra.mxu0 %v679_v48 }
  0x83   : > { %v1338_v51 = vpop.permute.xlu2 %204  ;;  %1027 = vmatpush.msra.mxu3 %v679_v48 }
  0x86   : > { %463 = vperm.xlu0 %1111, %v428_v49   ;;  %475 = vperm.xlu1 %1102, %v432_v50   ;;  %v678_v49 = vld [vmem:[%s1686_s1 + $0x18] sm:$0xff] }
  0x87   : > { %1104 = vset.pattern.permute.xlu2 %v1186_v40  ;;  %1028 = vmatpush.msra.mxu1 %v678_v49 }
  0x88   : > { %564 = vperm.xlu2 %1104, %v547_v52   ;;  %1029 = vmatpush.msra.mxu2 %v678_v49 }
  0x89   : > { %744 = vmatpush.msra.mxu0 %v678_v49  ;;  %1030 = vmatpush.msra.mxu3 %v678_v49 }
  0x8b   : > { %v1343_v54 = vpop.permute.xlu2 %213  ;;  %v1345_v55 = vpop.permute.xlu1 %186 }
  0x8c   : > { %v1348_v57 = vpop.permute.xlu0 %180  ;;  %vm229_vm6 = vcmp.eq.s32.totalorder %v1359_v2, %v1345_v55  ;;  %v677_v55 = vld [vmem:[%s1686_s1 + $0x10] sm:$0xff]  ;;  %vm238_vm14 = vcmp.eq.s32.totalorder %v1359_v2, %v1343_v54 }
  0x8d   : > { %1031 = vmatpush.msra.mxu1 %v677_v55  ;;  %1032 = vmatpush.msra.mxu2 %v677_v55 }
  0x8e   : > { %466 = vperm.xlu0 %1111, %v429_v53   ;;  %1106 = vset.pattern.permute.xlu1 %v1186_v40 }
  0x8f   : > { %591 = vperm.xlu1 %1106, %v556_v56   ;;  %v900_v56 = vsel %vm229_vm6, 1.0, %v1187_v9  ;;  %745 = vmatpush.msra.mxu0 %v677_v55  ;;  %vm683_vm6 = vcmask 523264  }
  0x90   : > { %603 = vperm.xlu2 %1104, %v560_v58   ;;  %1033 = vmatpush.msra.mxu3 %v677_v55 }
  0x93   : > { %v1353_v61 = vpop.permute.xlu2 %222  ;;  %v1355_v62 = vpop.permute.xlu1 %189 }
  0x94   : > { %v184_v63 = vpop.permute.xlu0 %183  ;;  %vm230_vm7 = vcmp.eq.s32.totalorder %v1359_v2, %v1355_v62 }
  0x95   : > { %vm228_vm0 = vcmp.eq.s32.totalorder %v1359_v2, %v184_v63  ;;  %v901_v58 = vsel %vm230_vm7, 1.0, %v1187_v9 }
  0x96   : > { %481 = vperm.xlu0 %1111, %v434_v59   ;;  %v899_v10 = vsel %vm228_vm0, 1.0, %v1187_v9 }
  0x97   : > { %1107 = vset.pattern.permute.xlu1 %v1185_v39 }
  0x98   : > { %1108 = vset.pattern.permute.xlu2 %v1185_v39  ;;  %439 = vperm.xlu1 %1107, %v420_v0   ;;  %v553_v0 = vadd.s32 48, %v1279_v12 }
  0x99   : > { %451 = vperm.xlu2 %1108, %v424_v1   ;;  %v549_v1 = vadd.s32 48, %v1259_v4 }
  0x9b   : > { %v1365_v5 = vpop.permute.xlu1 %201 }
  0x9c   : > { %v312_v15 = vpop.permute.xlu2 %311  ;;  %v199_v16 = vpop.permute.xlu0 %198  ;;  %vm234_vm11 = vcmp.eq.s32.totalorder %v1359_v2, %v1365_v5 }
  0x9d   : > { %vm356_vm1 = vcmp.eq.s32.totalorder %v1359_v2, %v312_v15  ;;  %vm233_vm2 = vcmp.eq.s32.totalorder %v1359_v2, %v199_v16  ;;  %v905_v47 = vsel %vm234_vm11, 1.0, %v1187_v9 }
  0x9e   : > { %v915_v19 = vsel %vm356_vm1, 1.0, %v1187_v9  ;;  %445 = vperm.xlu0 %1111, %v422_v3   ;;  %v904_v28 = vsel %vm233_vm2, 1.0, %v1187_v9  ;;  %v676_v3 = vld [vmem:[%s1686_s1 + $0x8] sm:$0xff]  ;;  %vm231_vm1 = vcmp.eq.s32.totalorder %v1359_v2, %v1326_v44 }
  0x9f   : > { %v1372_v22 = vadd.f32 %v915_v19, %v899_v10  ;;  %1034 = vmatpush.msra.mxu1 %v676_v3  ;;  %v675_v10 = vld [vmem:[%s1686_s1] sm:$0xff]  ;;  %1035 = vmatpush.msra.mxu2 %v676_v3 }
  0xa0   : > { %478 = vperm.xlu1 %1107, %v433_v18   ;;  %746 = vmatpush.msra.mxu0 %v676_v3 }
  0xa1   : > { %1109 = vset.pattern.permute.xlu2 %v1186_v40  ;;  %1037 = vmatpush.msra.mxu1 %v675_v10 }
  0xa2   : > { %567 = vperm.xlu2 %1109, %v548_v21   ;;  %1038 = vmatpush.msra.mxu2 %v675_v10  ;;  %v562_v21 = vadd.s32 48, %v1299_v20 }
  0xa3   : > { %v1375_v24 = vpop.permute.xlu1 %210  ;;  %1036 = vmatpush.msra.mxu3 %v676_v3  ;;  %747 = vmatpush.msra.mxu0 %v675_v10 }
  0xa4   : > { %v1377_v25 = vpop.permute.xlu2 %320  ;;  %v208_v26 = vpop.permute.xlu0 %207 }
  0xa5   : > { %vm236_vm4 = vcmp.eq.s32.totalorder %v1359_v2, %v208_v26  ;;  %v558_v26 = vadd.s32 48, %v1284_v13  ;;  %1039 = vmatpush.msra.mxu3 %v675_v10  ;;  %vm359_vm0 = vcmp.eq.s32.totalorder %v1359_v2, %v1377_v25 }
  0xa6   : > { %1118 = vset.pattern.permute.xlu0 %v1186_v40  ;;  %v907_v33 = vsel %vm236_vm4, 1.0, %v1187_v9 }
  0xa8   : > { %1110 = vset.pattern.permute.xlu1 %v1186_v40 }
  0xa9   : > { %579 = vperm.xlu1 %1110, %v552_v17  }
  0xaa   : > { %594 = vperm.xlu2 %1109, %v557_v27  }
  0xab   : > { %v1384_v8 = vpop.permute.xlu1 %219 }
  0xac   : > { %v327_v29 = vpop.permute.xlu2 %326  ;;  %v1387_v30 = vpop.permute.xlu0 %216 }
  0xad   : > { %vm361_vm3 = vcmp.eq.s32.totalorder %v1359_v2, %v327_v29  ;;  %v550_v29 = vadd.s32 48, %v1268_v7  ;;  %vm239_vm11 = vcmp.eq.s32.totalorder %v1359_v2, %v1387_v30 }
  0xae   : > { %v920_v6 = vsel %vm361_vm3, 1.0, %v1187_v9 }
  0xaf   : > { %v1392_v31 = vadd.f32 %v920_v6, %v904_v28  ;;  %v426_v6 = vadd.s32 32, %v1277_v11 }
  0xb1   : > { %1112 = vset.pattern.permute.xlu1 %v1184_v23  ;;  %v554_v23 = vadd.s32 48, %v1277_v11 }
  0xb2   : > { %1113 = vset.pattern.permute.xlu2 %v1185_v39  ;;  %353 = vperm.xlu1 %1112, %v306_v14   ;;  %v909_v14 = vsel %vm238_vm14, 1.0, %v1187_v9 }
  0xb3   : > { %442 = vperm.xlu2 %1113, %v421_v32   ;;  %585 = vperm.xlu0 %1118, %v554_v23   ;;  %v902_v32 = vsel %vm231_vm1, 1.0, %v1187_v9 }
  0xb4   : > { %v336_v34 = vpop.permute.xlu2 %335  ;;  %v1399_v35 = vpop.permute.xlu0 %225 }
  0xb5   : > { %vm364_vm5 = vcmp.eq.s32.totalorder %v1359_v2, %v336_v34  ;;  %v1405_v37 = vpop.permute.xlu1 %308 }
  0xb6   : > { %v923_v38 = vsel %vm364_vm5, 1.0, %v1187_v9  ;;  %vm235_vm5 = vcmp.eq.s32.totalorder %v1359_v2, %v1338_v51 }
  0xb7   : > { %v1412_v42 = vadd.f32 %v923_v38, %v907_v33 }
  0xba   : > { %1114 = vset.pattern.permute.xlu1 %v1185_v39 }
  0xbb   : > { %469 = vperm.xlu2 %1113, %v430_v43   ;;  %454 = vperm.xlu1 %1114, %v425_v45   ;;  %v906_v45 = vsel %vm235_vm5, 1.0, %v1187_v9 }
  0xbc   : > { %v1430_v53 = vpop.permute.xlu2 %344 }
  0xbd   : > { %v315_v50 = vpop.permute.xlu0 %314  ;;  %v318_v52 = vpop.permute.xlu1 %317 }
  0xbe   : > { %vm357_vm8 = vcmp.eq.s32.totalorder %v1359_v2, %v315_v50  ;;  %vm358_vm9 = vcmp.eq.s32.totalorder %v1359_v2, %v318_v52 }
  0xbf   : > { %v916_v59 = vsel %vm357_vm8, 1.0, %v1187_v9  ;;  %v917_v60 = vsel %vm358_vm9, 1.0, %v1187_v9  ;;  %vm227_vm9 = vcmp.eq.s32.totalorder %v1359_v2, %v1348_v57 }
  0xc0   : > { %v1441_v62 = vadd.f32 %v916_v59, %v900_v56  ;;  %v1443_v63 = vadd.f32 %v917_v60, %v901_v58  ;;  %v898_v58 = vsel %vm227_vm9, 1.0, %v1187_v9  ;;  %v910_v60 = vsel %vm239_vm11, 1.0, %v1187_v9 }
  0xc1   : > { %vm237_vm9 = vcmp.eq.s32.totalorder %v1359_v2, %v1375_v24 }
  0xc3   : > { %1116 = vset.pattern.permute.xlu2 %v1186_v40  ;;  %1115 = vset.pattern.permute.xlu1 %v1186_v40  ;;  %v903_v40 = vsel %vm232_vm10, 1.0, %v1187_v9  ;;  %vm355_vm10 = vcmp.eq.s32.totalorder %v1359_v2, %v1405_v37 }
  0xc4   : > { %582 = vperm.xlu2 %1116, %v553_v0   ;;  %570 = vperm.xlu1 %1115, %v549_v1   ;;  %v914_v59 = vsel %vm355_vm10, 1.0, %v1187_v9 }
  0xc5   : > { %v330_v4 = vpop.permute.xlu0 %329  ;;  %v324_v12 = vpop.permute.xlu1 %323  ;;  %v403_v37 = vadd.f32 %v914_v59, %v898_v58 }
  0xc6   : > { %vm362_vm12 = vcmp.eq.s32.totalorder %v1359_v2, %v330_v4  ;;  %vm360_vm13 = vcmp.eq.s32.totalorder %v1359_v2, %v324_v12  ;;  %v461_v15 = vpop.permute.xlu2 %460 }
  0xc7   : > { %v921_v16 = vsel %vm362_vm12, 1.0, %v1187_v9  ;;  %v919_v5 = vsel %vm360_vm13, 1.0, %v1187_v9  ;;  %vm491_vm7 = vcmp.eq.s32.totalorder %v1359_v2, %v461_v15  ;;  %vm367_vm12 = vcmp.eq.s32.totalorder %v1359_v2, %v1430_v53 }
  0xc8   : > { %v1465_v18 = vadd.f32 %v921_v16, %v905_v47  ;;  %v1467_v19 = vadd.f32 %v919_v5, %v903_v40  ;;  %v938_v48 = vsel %vm491_vm7, 1.0, %v1187_v9  ;;  %v926_v57 = vsel %vm367_vm12, 1.0, %v1187_v9 }
  0xc9   : > { %v415_v3 = vadd.f32 %v926_v57, %v910_v60 }
  0xcc   : > { %609 = vperm.xlu2 %1116, %v562_v21   ;;  %597 = vperm.xlu1 %1115, %v558_v26  }
  0xcd   : > { %v1471_v17 = vpop.permute.xlu0 %338  ;;  %v333_v27 = vpop.permute.xlu1 %332 }
  0xce   : > { %vm363_vm3 = vcmp.eq.s32.totalorder %v1359_v2, %v333_v27  ;;  %vm365_vm7 = vcmp.eq.s32.totalorder %v1359_v2, %v1471_v17  ;;  %v908_v17 = vsel %vm237_vm9, 1.0, %v1187_v9 }
  0xcf   : > { %v1473_v28 = vpop.permute.xlu2 %600  ;;  %v922_v38 = vsel %vm363_vm3, 1.0, %v1187_v9 }
  0xd0   : > { %v411_v46 = vadd.f32 %v922_v38, %v906_v45  ;;  %vm623_vm14 = vcmp.eq.s32.totalorder %v1359_v2, %v1473_v28 }
  0xd1   : > { %v958_v40 = vsel %vm623_vm14, 1.0, %v1187_v9 }
  0xd2   : > { %v539_v51 = vadd.f32 %v938_v48, %v411_v46 }
  0xd4   : > { %573 = vperm.xlu2 %1116, %v550_v29   ;;  %1117 = vset.pattern.permute.xlu1 %v1185_v39  ;;  %v918_v39 = vsel %vm359_vm0, 1.0, %v1187_v9 }
  0xd5   : > { %457 = vperm.xlu1 %1117, %v426_v6   ;;  %v1480_v13 = vpop.permute.xlu0 %347  ;;  %v342_v20 = vpop.permute.xlu1 %341  ;;  %v407_v34 = vadd.f32 %v918_v39, %v902_v32 }
  0xd6   : > { %vm366_vm15 = vcmp.eq.s32.totalorder %v1359_v2, %v342_v20  ;;  %vm368_vm1 = vcmp.eq.s32.totalorder %v1359_v2, %v1480_v13 }
  0xd7   : > { %v925_v7 = vsel %vm366_vm15, 1.0, %v1187_v9  ;;  %v927_v5 = vsel %vm368_vm1, 1.0, %v1187_v9 }
  0xd8   : > { %v1487_v11 = vadd.f32 %v925_v7, %v909_v14 }
  0xd9   : > { %v449_v54 = vpop.permute.xlu2 %448 }
  0xda   : > { %vm487_vm2 = vcmp.eq.s32.totalorder %v1359_v2, %v449_v54 }
  0xdb   : > { %v934_v33 = vsel %vm487_vm2, 1.0, %v1187_v9  ;;  %vm240_vm2 = vcmp.eq.s32.totalorder %v1359_v2, %v1384_v8 }
  0xdc   : > { %v535_v23 = vadd.f32 %v934_v33, %v407_v34  ;;  %v911_v21 = vsel %vm240_vm2, 1.0, %v1187_v9 }
  0xdd   : > { %v1495_v36 = vpop.permute.xlu1 %350  ;;  %v416_v28 = vadd.f32 %v927_v5, %v911_v21 }
  0xde   : > { %v577_v25 = vpop.permute.xlu0 %576  ;;  %vm369_vm14 = vcmp.eq.s32.totalorder %v1359_v2, %v1495_v36 }
  0xdf   : > { %vm615_vm4 = vcmp.eq.s32.totalorder %v1359_v2, %v577_v25  ;;  %v924_v25 = vsel %vm365_vm7, 1.0, %v1187_v9 }
  0xe0   : > { %v950_v44 = vsel %vm615_vm4, 1.0, %v1187_v9 }
  0xe1   : > { %v663_v41 = vadd.f32 %v950_v44, %v535_v23  ;;  %v413_v23 = vadd.f32 %v924_v25, %v908_v17 }
  0xe2   : > { %v565_v43 = vpop.permute.xlu2 %564 }
  0xe3   : > { %966 = vmatmul.msk.f32.vlgmr.msra.gmra.mxu1 %vm683_vm6, %v663_v41  ;;  %vm611_vm13 = vcmp.eq.s32.totalorder %v1359_v2, %v565_v43 }
  0xe4   : > { %v946_v30 = vsel %vm611_vm13, 1.0, %v1187_v9 }
  0xe6   : > { %v1507_v49 = vpop.permute.xlu0 %606 }
  0xe7   : > { %v589_v50 = vpop.permute.xlu1 %588 }
  0xe8   : > { %vm619_vm8 = vcmp.eq.s32.totalorder %v1359_v2, %v589_v50 }
  0xe9   : > { %v954_v52 = vsel %vm619_vm8, 1.0, %v1187_v9 }
  0xea   : > { %v667_v55 = vadd.f32 %v954_v52, %v539_v51  ;;  %v604_v56 = vpop.permute.xlu2 %603  ;;  %v928_v51 = vsel %vm369_vm14, 1.0, %v1187_v9 }
  0xeb   : > { %vm624_vm3 = vcmp.eq.s32.totalorder %v1359_v2, %v604_v56 }
  0xec   : > { %970 = vmatmul.msk.f32.vlgmr.msra.gmra.mxu2 %vm683_vm6, %v667_v55  ;;  %v959_v29 = vsel %vm624_vm3, 1.0, %v1187_v9 }
  0xf0   : > { %v473_v0 = vpop.permute.xlu0 %472  ;;  %v437_v1 = vpop.permute.xlu1 %436 }
  0xf1   : > { %vm495_vm15 = vcmp.eq.s32.totalorder %v1359_v2, %v473_v0  ;;  %vm483_vm0 = vcmp.eq.s32.totalorder %v1359_v2, %v437_v1 }
  0xf2   : > { %v942_v53 = vsel %vm495_vm15, 1.0, %v1187_v9  ;;  %v930_v10 = vsel %vm483_vm0, 1.0, %v1187_v9  ;;  %vm241_vm15 = vcmp.eq.s32.totalorder %v1359_v2, %v1353_v61  ;;  %vm625_vm0 = vcmp.eq.s32.totalorder %v1359_v2, %v1507_v49 }
  0xf3   : > { %v543_v4 = vadd.f32 %v942_v53, %v415_v3  ;;  %v531_v12 = vadd.f32 %v930_v10, %v403_v37  ;;  %v1534_v15 = vpop.permute.xlu2 %451  ;;  %v912_v52 = vsel %vm241_vm15, 1.0, %v1187_v9  ;;  %v960_v61 = vsel %vm625_vm0, 1.0, %v1187_v9 }
  0xf4   : > { %v417_v56 = vadd.f32 %v928_v51, %v912_v52  ;;  %vm488_vm2 = vcmp.eq.s32.totalorder %v1359_v2, %v1534_v15 }
  0xf5   : > { %v659_v47 = vadd.f32 %v946_v30, %v531_v12  ;;  %v671_v16 = vadd.f32 %v958_v40, %v543_v4  ;;  %v935_v60 = vsel %vm488_vm2, 1.0, %v1187_v9 }
  0xf6   : > { %v536_v37 = vadd.f32 %v935_v60, %v1467_v19 }
  0xf7   : > { %962 = vmatmul.msk.f32.vlgmr.msra.gmra.mxu0 %vm683_vm6, %v659_v47  ;;  %974 = vmatmul.msk.f32.vlgmr.msra.gmra.mxu3 %vm683_vm6, %v671_v16 }
  0xf8   : > { %v464_v26 = vpop.permute.xlu0 %463  ;;  %v476_v27 = vpop.permute.xlu1 %475 }
  0xf9   : > { %vm496_vm4 = vcmp.eq.s32.totalorder %v1359_v2, %v476_v27  ;;  %vm492_vm5 = vcmp.eq.s32.totalorder %v1359_v2, %v464_v26 }
  0xfa   : > { %v943_v8 = vsel %vm496_vm4, 1.0, %v1187_v9  ;;  %v939_v14 = vsel %vm492_vm5, 1.0, %v1187_v9  ;;  %vm242_vm4 = vcmp.eq.s32.totalorder %v1359_v2, %v1399_v35 }
  0xfb   : > { %v544_v6 = vadd.f32 %v943_v8, %v416_v28  ;;  %v540_v39 = vadd.f32 %v939_v14, %v1412_v42  ;;  %v913_v53 = vsel %vm242_vm4, 1.0, %v1187_v9 }
  0xfc   : > { %v568_v13 = vpop.permute.xlu2 %567 }
  0xfd   : > { %v672_v20 = vadd.f32 %v959_v29, %v544_v6  ;;  %vm612_vm12 = vcmp.eq.s32.totalorder %v1359_v2, %v568_v13 }
  0xfe   : > { %v947_v41 = vsel %vm612_vm12, 1.0, %v1187_v9 }
  0xff   : > { %975 = vmatmul.msk.f32.gmra.mxu3 %vm683_vm6, %v672_v20 }
 0x100   : > { %v467_v7 = vpop.permute.xlu0 %466 }
 0x101   : > { %v592_v54 = vpop.permute.xlu1 %591  ;;  %vm493_vm10 = vcmp.eq.s32.totalorder %v1359_v2, %v467_v7 }
 0x102   : > { %vm620_vm8 = vcmp.eq.s32.totalorder %v1359_v2, %v592_v54  ;;  %v940_v42 = vsel %vm493_vm10, 1.0, %v1187_v9 }
 0x103   : > { %v955_v32 = vsel %vm620_vm8, 1.0, %v1187_v9  ;;  %v541_v24 = vadd.f32 %v940_v42, %v413_v23 }
 0x104   : > { %v668_v33 = vadd.f32 %v955_v32, %v540_v39  ;;  %v595_v34 = vpop.permute.xlu2 %594 }
 0x105   : > { %vm621_vm11 = vcmp.eq.s32.totalorder %v1359_v2, %v595_v34 }
 0x106   : > { %971 = vmatmul.msk.f32.gmra.mxu2 %vm683_vm6, %v668_v33  ;;  %v956_v44 = vsel %vm621_vm11, 1.0, %v1187_v9 }
 0x107   : > { %v669_v43 = vadd.f32 %v956_v44, %v541_v24 }
 0x108   : > { %v482_v3 = vpop.permute.xlu0 %481 }
 0x109   : > { %vm498_vm5 = vcmp.eq.s32.totalorder %v1359_v2, %v482_v3 }
 0x10a   : > { %v440_v38 = vpop.permute.xlu1 %439  ;;  %v945_v12 = vsel %vm498_vm5, 1.0, %v1187_v9 }
 0x10b   : > { %vm484_vm13 = vcmp.eq.s32.totalorder %v1359_v2, %v440_v38 }
 0x10c   : > { %v931_v45 = vsel %vm484_vm13, 1.0, %v1187_v9 }
 0x10d   : > { %v532_v46 = vadd.f32 %v931_v45, %v1372_v22  ;;  %v443_v48 = vpop.permute.xlu2 %442 }
 0x10e   : > { %972 = vmatmul.msk.f32.gmra.mxu2 %vm683_vm6, %v669_v43  ;;  %vm485_vm11 = vcmp.eq.s32.totalorder %v1359_v2, %v443_v48 }
 0x10f   : > { %v660_v50 = vadd.f32 %v947_v41, %v532_v46  ;;  %v932_v27 = vsel %vm485_vm11, 1.0, %v1187_v9 }
 0x110   : > { %v446_v28 = vpop.permute.xlu0 %445  ;;  %v533_v8 = vadd.f32 %v932_v27, %v1441_v62 }
 0x111   : > { %963 = vmatmul.msk.f32.gmra.mxu0 %vm683_vm6, %v660_v50  ;;  %vm486_vm13 = vcmp.eq.s32.totalorder %v1359_v2, %v446_v28 }
 0x112   : > { %v479_v55 = vpop.permute.xlu1 %478  ;;  %v933_v20 = vsel %vm486_vm13, 1.0, %v1187_v9 }
 0x113   : > { %vm497_vm1 = vcmp.eq.s32.totalorder %v1359_v2, %v479_v55  ;;  %v534_v54 = vadd.f32 %v933_v20, %v1443_v63 }
 0x114   : > { %v944_v22 = vsel %vm497_vm1, 1.0, %v1187_v9 }
 0x115   : > { %v545_v36 = vadd.f32 %v944_v22, %v417_v56  ;;  %v470_v58 = vpop.permute.xlu2 %469 }
 0x116   : > { %vm494_vm14 = vcmp.eq.s32.totalorder %v1359_v2, %v470_v58 }
 0x117   : > { %v673_v59 = vadd.f32 %v960_v61, %v545_v36  ;;  %v941_v14 = vsel %vm494_vm14, 1.0, %v1187_v9 }
 0x118   : > { %v542_v39 = vadd.f32 %v941_v14, %v1487_v11 }
 0x119   : > { %976 = vmatmul.msk.f32.gmra.mxu3 %vm683_vm6, %v673_v59 }
 0x11b   : > { %v580_v57 = vpop.permute.xlu1 %579 }
 0x11c   : > { %vm616_vm3 = vcmp.eq.s32.totalorder %v1359_v2, %v580_v57 }
 0x11d   : > { %v951_v49 = vsel %vm616_vm3, 1.0, %v1187_v9 }
 0x11e   : > { %v664_v0 = vadd.f32 %v951_v49, %v536_v37  ;;  %v583_v1 = vpop.permute.xlu2 %582 }
 0x11f   : > { %vm617_vm9 = vcmp.eq.s32.totalorder %v1359_v2, %v583_v1 }
 0x120   : > { %967 = vmatmul.msk.f32.gmra.mxu1 %vm683_vm6, %v664_v0  ;;  %v952_v16 = vsel %vm617_vm9, 1.0, %v1187_v9 }
 0x124   : > { %v354_v30 = vpop.permute.xlu1 %353 }
 0x125   : > { %vm370_vm7 = vcmp.eq.s32.totalorder %v1359_v2, %v354_v30  ;;  %v586_v25 = vpop.permute.xlu0 %585 }
 0x126   : > { %v929_v19 = vsel %vm370_vm7, 1.0, %v1187_v9  ;;  %v610_v10 = vpop.permute.xlu2 %609  ;;  %vm618_vm1 = vcmp.eq.s32.totalorder %v1359_v2, %v586_v25 }
 0x127   : > { %v418_v4 = vadd.f32 %v929_v19, %v913_v53  ;;  %vm626_vm8 = vcmp.eq.s32.totalorder %v1359_v2, %v610_v10  ;;  %v953_v11 = vsel %vm618_vm1, 1.0, %v1187_v9 }
 0x128   : > { %v961_v15 = vsel %vm626_vm8, 1.0, %v1187_v9 }
 0x129   : > { %v546_v40 = vadd.f32 %v945_v12, %v418_v4 }
 0x12b   : > { %v674_v35 = vadd.f32 %v961_v15, %v546_v40 }
 0x12d   : > { %977 = vmatmul.msk.f32.gmra.mxu3 %vm683_vm6, %v674_v35  ;;  %v455_v47 = vpop.permute.xlu1 %454 }
 0x12e   : > { %vm489_vm10 = vcmp.eq.s32.totalorder %v1359_v2, %v455_v47  ;;  %v574_v6 = vpop.permute.xlu2 %573 }
 0x12f   : > { %v936_v5 = vsel %vm489_vm10, 1.0, %v1187_v9  ;;  %vm614_vm15 = vcmp.eq.s32.totalorder %v1359_v2, %v574_v6 }
 0x130   : > { %v537_v21 = vadd.f32 %v936_v5, %v1392_v31  ;;  %v949_v62 = vsel %vm614_vm15, 1.0, %v1187_v9 }
 0x131   : > { %v662_v33 = vadd.f32 %v949_v62, %v534_v54 }
 0x132   : > { %v665_v26 = vadd.f32 %v952_v16, %v537_v21 }
 0x134   : > { %968 = vmatmul.msk.f32.gmra.mxu1 %vm683_vm6, %v665_v26 }
 0x136   : > { %v571_v29 = vpop.permute.xlu1 %570 }
 0x137   : > { %vm613_vm12 = vcmp.eq.s32.totalorder %v1359_v2, %v571_v29 }
 0x138   : > { %v948_v13 = vsel %vm613_vm12, 1.0, %v1187_v9 }
 0x139   : > { %v661_v31 = vadd.f32 %v948_v13, %v533_v8 }
 0x13b   : > { %964 = vmatmul.msk.f32.gmra.mxu0 %vm683_vm6, %v661_v31 }
 0x13e   : > { %v598_v7 = vpop.permute.xlu1 %597 }
 0x13f   : > { %vm622_vm0 = vcmp.eq.s32.totalorder %v1359_v2, %v598_v7 }
 0x140   : > { %v957_v32 = vsel %vm622_vm0, 1.0, %v1187_v9 }
 0x141   : > { %v670_v34 = vadd.f32 %v957_v32, %v542_v39 }
 0x143   : > { %965 = vmatmul.msk.f32.gmra.mxu0 %vm683_vm6, %v662_v33  ;;  %973 = vmatmul.msk.f32.gmra.mxu2 %vm683_vm6, %v670_v34 }
 0x147   : > { %v458_v17 = vpop.permute.xlu1 %457 }
 0x148   : > { %vm490_vm2 = vcmp.eq.s32.totalorder %v1359_v2, %v458_v17 }
 0x149   : > { %v937_v63 = vsel %vm490_vm2, 1.0, %v1187_v9 }
 0x14a   : > { %v538_v42 = vadd.f32 %v937_v63, %v1465_v18 }
 0x14c   : > { %v666_v23 = vadd.f32 %v953_v11, %v538_v42 }
 0x14e   : > { %969 = vmatmul.msk.f32.gmra.mxu1 %vm683_vm6, %v666_v23 }
 0x160   : > { %v761_v44 = vpop.f32.mrf.mxu1 }
 0x161   : > { %801 = vst [vmem:[%s1633_s25 + $0x20] sm:$0xff] %v761_v44 }
 0x16f   : > { %v773_v2 = vpop.f32.mrf.mxu2 }
 0x170   : > { %805 = vst [vmem:[%s1633_s25 + $0x40] sm:$0xff] %v773_v2 }
 0x174   : > { %v749_v9 = vpop.f32.mrf.mxu0 }
 0x175   : > { %797 = vst [vmem:[%s1633_s25] sm:$0xff] %v749_v9 }
 0x17a   : > { %v785_v18 = vpop.f32.mrf.mxu3 }
 0x17b   : > { %809 = vst [vmem:[%s1633_s25 + $0x60] sm:$0xff] %v785_v18 }
 0x182   : > { %v788_v24 = vpop.f32.mrf.mxu3 }
 0x183   : > { %810 = vst [vmem:[%s1633_s25 + $0x68] sm:$0xff] %v788_v24 }
 0x189   : > { %v776_v38 = vpop.f32.mrf.mxu2 }
 0x18a   : > { %806 = vst [vmem:[%s1633_s25 + $0x48] sm:$0xff] %v776_v38 }
 0x18e   : > { %v752_v41 = vpop.f32.mrf.mxu0 }
 0x18f   : > { %798 = vst [vmem:[%s1633_s25 + $0x8] sm:$0xff] %v752_v41 }
 0x191   : > { %v779_v43 = vpop.f32.mrf.mxu2 }
 0x192   : > { %807 = vst [vmem:[%s1633_s25 + $0x50] sm:$0xff] %v779_v43 }
 0x19c   : > { %v791_v45 = vpop.f32.mrf.mxu3 }
 0x19d   : > { %811 = vst [vmem:[%s1633_s25 + $0x70] sm:$0xff] %v791_v45  ;;  %v764_v46 = vpop.f32.mrf.mxu1 }
 0x19e   : > { %802 = vst [vmem:[%s1633_s25 + $0x28] sm:$0xff] %v764_v46 }
 0x1b0   : > { %v794_v48 = vpop.f32.mrf.mxu3 }
 0x1b1   : > { %812 = vst [vmem:[%s1633_s25 + $0x78] sm:$0xff] %v794_v48  ;;  %v767_v50 = vpop.f32.mrf.mxu1 }
 0x1b2   : > { %803 = vst [vmem:[%s1633_s25 + $0x30] sm:$0xff] %v767_v50 }
 0x1b8   : > { %v755_v51 = vpop.f32.mrf.mxu0 }
 0x1b9   : > { %799 = vst [vmem:[%s1633_s25 + $0x10] sm:$0xff] %v755_v51 }
 0x1c0   : > { %v758_v52 = vpop.f32.mrf.mxu0 }
 0x1c1   : > { %800 = vst [vmem:[%s1633_s25 + $0x18] sm:$0xff] %v758_v52 }
 0x1c6   : > { %v782_v55 = vpop.f32.mrf.mxu2 }
 0x1c7   : > { %808 = vst [vmem:[%s1633_s25 + $0x58] sm:$0xff] %v782_v55 }
 0x1cb   : > { %v770_v56 = vpop.f32.mrf.mxu1 }
 0x1cc   : > { %804 = vst [vmem:[%s1633_s25 + $0x38] sm:$0xff] %v770_v56 }
 0x1cd   : > { %1146 = shalt.err (!%p1143_p3)
}
 0x1ce   : > { %s1188_s17 = smov 128   ;;  %s1189_s21 = smov 8  }
 0x1cf   : > { %1047 = dma.vmem_to_hbm [thread:$0]  (%p1243_p5), %s827_s30, 2048, %s829_s3, %s814_s4, %s1188_s17, %s1188_s17, %s1189_s21  }
 0x1d0 PF: > { %p1053_p4 = scmp.ge.s32.totalorder %s1181_s12, 2  ;;  %s843_s22 = sand.u32 1, %s1169_s9  }
 0x1d1   : > { %s844_s23 = scalar_lea.sflag [#allocation3], %s843_s22 }
 0x1d2   : > { %p1050_p7 = pnand %p1053_p4, %p1247_p6 }
 0x1d4   : > { %p1051_p8 = pneg %p1050_p7 }
 0x1d6   : > { %1164 = dma.done.wait (%p1051_p8), %s844_s23, 2048  }
 0x1d7   : > { %1166 = vsyncadd (%p1051_p8), %s844_s23, 4294965248  ;;  %p12_p9 = scmp.ge.s32.totalorder %s1230_s15, 5   ;;  %s1690_s9 = smov %s1173_s10 }
 0x1d8   : > { %s1691_s10 = smov %s1177_s11  ;;  %s1692_s11 = smov %s1241_s18 }
 0x1d9   : > { %s1693_s12 = smov %s1230_s15  ;;  %14 = sbr.rel (!%p12_p9) target bundleno = 3 (0x3), region = 63 }
 0x1de   :  { %850 = vsyncpa [#allocation3], 1 }
 0x1df   :  { %852 = vsyncpa [#allocation3 + $0x1], 1 }

</bundles_post_ra>
